<compile_context>
chip_gen: v6e
topology: v6e:2x2x1
jax: 0.10.0
libtpu: 0.0.40
codegen_flags: <defaults>
</compile_context>

<pallas_src>
import math

import jax
import jax.numpy as jnp
from jax.experimental import pallas as pl
from jax.experimental.pallas import tpu as pltpu

SMOOTH = 1.0
DICE_WEIGHT = 0.5
BCE_WEIGHT = 0.5

_LANES = 128
_SUBLANES = 8
_MAX_TILE_ROWS = 2048   # 2048*128 f32 = 1 MiB per input buffer -> ~2 MiB DMA per grid step
_STRIP_ROWS = 64        # rows per inner strip (8 vregs per f32 temp -> stays in vregs)


def _strip_bounds(tile_rows, strip=_STRIP_ROWS):
    """Static (start, size) strip decomposition of a tile; every size is a multiple of 8."""
    bounds, r = [], 0
    while r < tile_rows:
        sz = min(strip, tile_rows - r)
        bounds.append((r, sz))
        r += sz
    return tuple(bounds)


def _make_kernel(tile_rows, strip_bounds, n_valid, mask_needed):
    """Builds the per-config kernel (all tiling facts are static Python values)."""

    def kernel(x_ref, t_ref, bce_ref, inter_ref, union_ref):
        # x_ref, t_ref:               (tile_rows, 128) input tiles (batch dim squeezed)
        # bce/inter/union_ref:        (8, 128) per-sample accumulators, resident over chunks
        chunk = pl.program_id(1)

        @pl.when(chunk == 0)
        def _init():
            bce_ref[...] = jnp.zeros_like(bce_ref)
            inter_ref[...] = jnp.zeros_like(inter_ref)
            union_ref[...] = jnp.zeros_like(union_ref)

        bce_acc = jnp.zeros((_SUBLANES, _LANES), jnp.float32)
        inter_acc = jnp.zeros((_SUBLANES, _LANES), jnp.float32)
        union_acc = jnp.zeros((_SUBLANES, _LANES), jnp.float32)

        for r0, sz in strip_bounds:            # static strips: zero-cost static slices
            x = x_ref[pl.ds(r0, sz), :].astype(jnp.float32)
            t = t_ref[pl.ds(r0, sz), :].astype(jnp.float32)

            # Share exp(-|x|) between the stable BCE term and sigmoid (1 exp / element).
            e = jnp.exp(-jnp.abs(x))
            bce_elem = jnp.maximum(x, 0.0) - x * t + jnp.log1p(e)
            inv = pl.reciprocal(1.0 + e, approx=True)          # EUP rcp, no VPU refinement
            probs = jnp.where(x >= 0.0, inv, e * inv)           # == sigmoid(x), stable
            inter_elem = probs * t
            union_elem = probs + t

            if mask_needed:
                # Ragged tail: compare flat per-sample element index against the true
                # element count (garbage / padded elements contribute exactly nothing).
                base = (chunk * tile_rows + r0) * _LANES
                eidx = (base
                        + jax.lax.broadcasted_iota(jnp.int32, (sz, _LANES), 0) * _LANES
                        + jax.lax.broadcasted_iota(jnp.int32, (sz, _LANES), 1))
                valid = eidx < n_valid
                bce_elem = jnp.where(valid, bce_elem, 0.0)
                inter_elem = jnp.where(valid, inter_elem, 0.0)
                union_elem = jnp.where(valid, union_elem, 0.0)

            # (sz, 128) -> (8, 128): sublane-group adds only (no cross-lane XLU reduce).
            bce_acc = bce_acc + jnp.sum(bce_elem.reshape(-1, _SUBLANES, _LANES), axis=0)
            inter_acc = inter_acc + jnp.sum(inter_elem.reshape(-1, _SUBLANES, _LANES), axis=0)
            union_acc = union_acc + jnp.sum(union_elem.reshape(-1, _SUBLANES, _LANES), axis=0)

        bce_ref[...] += bce_acc
        inter_ref[...] += inter_acc
        union_ref[...] += union_acc

    return kernel


def bce_dice_loss(inputs, targets, *, max_tile_rows=_MAX_TILE_ROWS):
    """0.5 * BCEWithLogits + 0.5 * DiceLoss over (B, C, H, W) logits/targets.

    Any float logits (f32/bf16) and float/int/bool targets are accepted; math is f32
    inside the kernel. Feeding bf16 logits + int8/bool targets from upstream cuts HBM
    traffic ~2.6x — do not pre-cast here. Returns a scalar f32 loss.
    """
    B = inputs.shape[0]
    N = math.prod(inputs.shape[1:])

    x = inputs.reshape(B, N)          # matches .view(batch_size, -1) of the reference
    t = targets.reshape(B, N)

    # Lane-dense per-sample layout (B, rows, 128); zero-copy whenever N % 128 == 0.
    rows = -(-N // _LANES)
    rows = max(rows, _SUBLANES)       # at least one full (8, 128) slab per sample
    pad = rows * _LANES - N
    if pad:
        # TODO(synk): lane-ragged / tiny inputs still take one HBM pad copy; prefer
        # C*H*W a multiple of 128 (ideally 1024) upstream to stay on the zero-copy path.
        x = jnp.pad(x, ((0, 0), (0, pad)))
        t = jnp.pad(t, ((0, 0), (0, pad)))
    x = x.reshape(B, rows, _LANES)
    t = t.reshape(B, rows, _LANES)

    tile_rows = min(max_tile_rows, (rows // _SUBLANES) * _SUBLANES)   # multiple of 8
    num_chunks = -(-rows // tile_rows)
    covered = num_chunks * tile_rows * _LANES
    mask_needed = covered != N        # ragged last chunk (OOB rows and/or padded lanes)

    kernel = _make_kernel(tile_rows, _strip_bounds(tile_rows), N, mask_needed)

    part_shape = jax.ShapeDtypeStruct((B, _SUBLANES, _LANES), jnp.float32)
    in_spec = pl.BlockSpec((None, tile_rows, _LANES), lambda b, c: (b, c, 0))
    out_spec = pl.BlockSpec((None, _SUBLANES, _LANES), lambda b, c: (b, 0, 0))

    bytes_in = int(x.size) * x.dtype.itemsize + int(t.size) * t.dtype.itemsize
    cost = pl.CostEstimate(
        flops=int(12 * B * rows * _LANES),
        transcendentals=int(2 * B * rows * _LANES),
        bytes_accessed=int(bytes_in + 3 * B * _SUBLANES * _LANES * 4),
    )

    bce_p, inter_p, union_p = pl.pallas_call(
        kernel,
        out_shape=(part_shape, part_shape, part_shape),
        grid=(B, num_chunks),
        in_specs=[in_spec, in_spec],
        out_specs=(out_spec, out_spec, out_spec),
        compiler_params=pltpu.CompilerParams(
            dimension_semantics=("parallel", "arbitrary")),
        cost_estimate=cost,
    )(x, t)

    # Tiny scalar combine in plain JAX (per-sample partials -> final loss).
    bce_loss = jnp.sum(bce_p) / jnp.float32(B * N)       # mean over true element count
    intersection = jnp.sum(inter_p, axis=(1, 2))         # (B,)
    union = jnp.sum(union_p, axis=(1, 2))                # (B,)
    dice = (2.0 * intersection + SMOOTH) / (union + SMOOTH)
    dice_loss = 1.0 - jnp.mean(dice)
    return BCE_WEIGHT * bce_loss + DICE_WEIGHT * dice_loss


def _reference(inputs, targets):
    # pure-JAX reference of the PyTorch module, for a sanity check
    x = inputs.astype(jnp.float32).reshape(inputs.shape[0], -1)
    t = targets.astype(jnp.float32).reshape(targets.shape[0], -1)
    bce = jnp.mean(jnp.maximum(x, 0.0) - x * t + jnp.log1p(jnp.exp(-jnp.abs(x))))
    p = jax.nn.sigmoid(x)
    inter = jnp.sum(p * t, axis=1)
    union = jnp.sum(p, axis=1) + jnp.sum(t, axis=1)
    dice = (2.0 * inter + SMOOTH) / (union + SMOOTH)
    dice_loss = 1.0 - jnp.mean(dice)
    return BCE_WEIGHT * bce + DICE_WEIGHT * dice_loss


if __name__ == "__main__":
    key = jax.random.PRNGKey(0)
    k1, k2, k3, k4 = jax.random.split(key, 4)

    # Case 1: B=2, C=4, H=16, W=16  (N = 1024 -> zero-copy layout, single chunk).
    B, C, H, W = 2, 4, 16, 16
    logits = jax.random.normal(k1, (B, C, H, W), dtype=jnp.float32)
    targets = (jax.random.uniform(k2, (B, C, H, W)) > 0.5).astype(jnp.float32)
    loss = bce_dice_loss(logits, targets)
    jax.block_until_ready(loss)
    ref = _reference(logits, targets)
    # approx reciprocal in the dice path -> slightly looser tolerance than exact math
    assert jnp.allclose(loss, ref, atol=2e-3, rtol=2e-3), (loss, ref)

    # Case 2: N = 3*16*32 = 1536 (12 rows): multi-chunk with ragged last chunk, no jnp.pad
    # (exercises the in-kernel element-count masking and cross-chunk accumulation).
    logits2 = jax.random.normal(k3, (2, 3, 16, 32), dtype=jnp.float32)
    targets2 = (jax.random.uniform(k4, (2, 3, 16, 32)) > 0.5).astype(jnp.float32)
    loss2 = bce_dice_loss(logits2, targets2)
    jax.block_until_ready(loss2)
    ref2 = _reference(logits2, targets2)
    assert jnp.allclose(loss2, ref2, atol=2e-3, rtol=2e-3), (loss2, ref2)

    print("KERNEL_OK")
</pallas_src>

<mosaic_0001>
module attributes {stable_mosaic.version = 11 : i64} {
  func.func @kernel(%arg0: i32, %arg1: i32, %arg2: memref<1x8x128xf32, #tpu.memory_space<vmem>>, %arg3: memref<1x8x128xf32, #tpu.memory_space<vmem>>, %arg4: memref<1x8x128xf32, #tpu.memory_space<vmem>>, %arg5: memref<1x8x128xf32, #tpu.memory_space<vmem>>, %arg6: memref<1x8x128xf32, #tpu.memory_space<vmem>>) attributes {dimension_semantics = [#tpu.dimension_semantics<parallel>, #tpu.dimension_semantics<arbitrary>], iteration_bounds = array<i64: 2, 1>, scalar_prefetch = 0 : i64, scratch_operands = 0 : i64, tpu.core_type = #tpu.core_type<tc>, window_params = [{transform_indices = @transform_0, window_bounds = array<i64: 1, 8, 128>}, {transform_indices = @transform_1, window_bounds = array<i64: 1, 8, 128>}, {transform_indices = @transform_2, window_bounds = array<i64: 1, 8, 128>}, {transform_indices = @transform_3, window_bounds = array<i64: 1, 8, 128>}, {transform_indices = @transform_4, window_bounds = array<i64: 1, 8, 128>}]} {
    %c0_i32 = arith.constant 0 : i32
    %0 = arith.cmpi eq, %arg1, %c0_i32 : i32
    %1 = arith.extui %0 : i1 to i32
    %c0_i32_0 = arith.constant 0 : i32
    %2 = arith.cmpi ne, %1, %c0_i32_0 : i32
    scf.if %2 {
      %cst_33 = arith.constant 0.000000e+00 : f32
      %56 = vector.broadcast %cst_33 : f32 to vector<8x128xf32>
      %c0_34 = arith.constant 0 : index
      %c0_35 = arith.constant 0 : index
      %c0_36 = arith.constant 0 : index
      %57 = vector.load %arg4[%c0_34, %c0_35, %c0_36] : memref<1x8x128xf32, #tpu.memory_space<vmem>>, vector<1x8x128xf32>
      %58 = vector.shape_cast %57 : vector<1x8x128xf32> to vector<8x128xf32>
      %59 = vector.shape_cast %56 : vector<8x128xf32> to vector<1x8x128xf32>
      tpu.vector_store %arg4[%c0_34, %c0_35, %c0_36], %59 {strides = array<i32>} : memref<1x8x128xf32, #tpu.memory_space<vmem>>, vector<1x8x128xf32>,
      %cst_37 = arith.constant 0.000000e+00 : f32
      %60 = vector.broadcast %cst_37 : f32 to vector<8x128xf32>
      %c0_38 = arith.constant 0 : index
      %c0_39 = arith.constant 0 : index
      %c0_40 = arith.constant 0 : index
      %61 = vector.load %arg5[%c0_38, %c0_39, %c0_40] : memref<1x8x128xf32, #tpu.memory_space<vmem>>, vector<1x8x128xf32>
      %62 = vector.shape_cast %61 : vector<1x8x128xf32> to vector<8x128xf32>
      %63 = vector.shape_cast %60 : vector<8x128xf32> to vector<1x8x128xf32>
      tpu.vector_store %arg5[%c0_38, %c0_39, %c0_40], %63 {strides = array<i32>} : memref<1x8x128xf32, #tpu.memory_space<vmem>>, vector<1x8x128xf32>,
      %cst_41 = arith.constant 0.000000e+00 : f32
      %64 = vector.broadcast %cst_41 : f32 to vector<8x128xf32>
      %c0_42 = arith.constant 0 : index
      %c0_43 = arith.constant 0 : index
      %c0_44 = arith.constant 0 : index
      %65 = vector.load %arg6[%c0_42, %c0_43, %c0_44] : memref<1x8x128xf32, #tpu.memory_space<vmem>>, vector<1x8x128xf32>
      %66 = vector.shape_cast %65 : vector<1x8x128xf32> to vector<8x128xf32>
      %67 = vector.shape_cast %64 : vector<8x128xf32> to vector<1x8x128xf32>
      tpu.vector_store %arg6[%c0_42, %c0_43, %c0_44], %67 {strides = array<i32>} : memref<1x8x128xf32, #tpu.memory_space<vmem>>, vector<1x8x128xf32>,
    } else {
    }
    %cst = arith.constant 0.000000e+00 : f32
    %3 = vector.broadcast %cst : f32 to vector<8x128xf32>
    %cst_1 = arith.constant 0.000000e+00 : f32
    %4 = vector.broadcast %cst_1 : f32 to vector<8x128xf32>
    %cst_2 = arith.constant 0.000000e+00 : f32
    %5 = vector.broadcast %cst_2 : f32 to vector<8x128xf32>
    %c0 = arith.constant 0 : index
    %c0_3 = arith.constant 0 : index
    %c0_4 = arith.constant 0 : index
    %6 = vector.load %arg2[%c0, %c0_3, %c0_4] : memref<1x8x128xf32, #tpu.memory_space<vmem>>, vector<1x8x128xf32>
    %7 = vector.shape_cast %6 : vector<1x8x128xf32> to vector<8x128xf32>
    %c0_5 = arith.constant 0 : index
    %c0_6 = arith.constant 0 : index
    %c0_7 = arith.constant 0 : index
    %8 = vector.load %arg3[%c0_5, %c0_6, %c0_7] : memref<1x8x128xf32, #tpu.memory_space<vmem>>, vector<1x8x128xf32>
    %9 = vector.shape_cast %8 : vector<1x8x128xf32> to vector<8x128xf32>
    %10 = math.absf %7 : vector<8x128xf32>
    %cst_8 = arith.constant 0.000000e+00 : f32
    %11 = vector.broadcast %cst_8 : f32 to vector<8x128xf32>
    %12 = arith.subf %11, %10 : vector<8x128xf32>
    %13 = math.exp %12 : vector<8x128xf32>
    %cst_9 = arith.constant 0.000000e+00 : f32
    %14 = vector.broadcast %cst_9 : f32 to vector<8x128xf32>
    %15 = arith.maximumf %7, %14 : vector<8x128xf32>
    %16 = arith.mulf %7, %9 : vector<8x128xf32>
    %17 = arith.subf %15, %16 : vector<8x128xf32>
    %18 = math.log1p %13 : vector<8x128xf32>
    %19 = arith.addf %17, %18 : vector<8x128xf32>
    %cst_10 = arith.constant 1.000000e+00 : f32
    %20 = vector.broadcast %cst_10 : f32 to vector<8x128xf32>
    %21 = arith.addf %20, %13 : vector<8x128xf32>
    %22 = tpu.reciprocal %21 {approx = true} : vector<8x128xf32> -> vector<8x128xf32>
    %cst_11 = arith.constant 0.000000e+00 : f32
    %23 = vector.broadcast %cst_11 : f32 to vector<8x128xf32>
    %24 = arith.cmpf oge, %7, %23 : vector<8x128xf32>
    %25 = arith.mulf %13, %22 : vector<8x128xf32>
    %26 = arith.select %24, %22, %25 : vector<8x128xi1>, vector<8x128xf32>
    %27 = arith.mulf %26, %9 : vector<8x128xf32>
    %28 = arith.addf %26, %9 : vector<8x128xf32>
    %29 = vector.shape_cast %19 : vector<8x128xf32> to vector<1x8x128xf32>
    %cst_12 = arith.constant dense<0.000000e+00> : vector<8x128xf32>
    %30 = vector.multi_reduction <add>, %29, %cst_12 [0] : vector<1x8x128xf32> to vector<8x128xf32>
    %31 = arith.addf %3, %30 : vector<8x128xf32>
    %32 = vector.shape_cast %27 : vector<8x128xf32> to vector<1x8x128xf32>
    %cst_13 = arith.constant dense<0.000000e+00> : vector<8x128xf32>
    %33 = vector.multi_reduction <add>, %32, %cst_13 [0] : vector<1x8x128xf32> to vector<8x128xf32>
    %34 = arith.addf %4, %33 : vector<8x128xf32>
    %35 = vector.shape_cast %28 : vector<8x128xf32> to vector<1x8x128xf32>
    %cst_14 = arith.constant dense<0.000000e+00> : vector<8x128xf32>
    %36 = vector.multi_reduction <add>, %35, %cst_14 [0] : vector<1x8x128xf32> to vector<8x128xf32>
    %37 = arith.addf %5, %36 : vector<8x128xf32>
    %c0_15 = arith.constant 0 : index
    %c0_16 = arith.constant 0 : index
    %c0_17 = arith.constant 0 : index
    %38 = vector.load %arg4[%c0_15, %c0_16, %c0_17] : memref<1x8x128xf32, #tpu.memory_space<vmem>>, vector<1x8x128xf32>
    %39 = vector.shape_cast %38 : vector<1x8x128xf32> to vector<8x128xf32>
    %40 = arith.addf %39, %31 : vector<8x128xf32>
    %c0_18 = arith.constant 0 : index
    %c0_19 = arith.constant 0 : index
    %c0_20 = arith.constant 0 : index
    %41 = vector.load %arg4[%c0_18, %c0_19, %c0_20] : memref<1x8x128xf32, #tpu.memory_space<vmem>>, vector<1x8x128xf32>
    %42 = vector.shape_cast %41 : vector<1x8x128xf32> to vector<8x128xf32>
    %43 = vector.shape_cast %40 : vector<8x128xf32> to vector<1x8x128xf32>
    tpu.vector_store %arg4[%c0_18, %c0_19, %c0_20], %43 {strides = array<i32>} : memref<1x8x128xf32, #tpu.memory_space<vmem>>, vector<1x8x128xf32>,
    %c0_21 = arith.constant 0 : index
    %c0_22 = arith.constant 0 : index
    %c0_23 = arith.constant 0 : index
    %44 = vector.load %arg5[%c0_21, %c0_22, %c0_23] : memref<1x8x128xf32, #tpu.memory_space<vmem>>, vector<1x8x128xf32>
    %45 = vector.shape_cast %44 : vector<1x8x128xf32> to vector<8x128xf32>
    %46 = arith.addf %45, %34 : vector<8x128xf32>
    %c0_24 = arith.constant 0 : index
    %c0_25 = arith.constant 0 : index
    %c0_26 = arith.constant 0 : index
    %47 = vector.load %arg5[%c0_24, %c0_25, %c0_26] : memref<1x8x128xf32, #tpu.memory_space<vmem>>, vector<1x8x128xf32>
    %48 = vector.shape_cast %47 : vector<1x8x128xf32> to vector<8x128xf32>
    %49 = vector.shape_cast %46 : vector<8x128xf32> to vector<1x8x128xf32>
    tpu.vector_store %arg5[%c0_24, %c0_25, %c0_26], %49 {strides = array<i32>} : memref<1x8x128xf32, #tpu.memory_space<vmem>>, vector<1x8x128xf32>,
    %c0_27 = arith.constant 0 : index
    %c0_28 = arith.constant 0 : index
    %c0_29 = arith.constant 0 : index
    %50 = vector.load %arg6[%c0_27, %c0_28, %c0_29] : memref<1x8x128xf32, #tpu.memory_space<vmem>>, vector<1x8x128xf32>
    %51 = vector.shape_cast %50 : vector<1x8x128xf32> to vector<8x128xf32>
    %52 = arith.addf %51, %37 : vector<8x128xf32>
    %c0_30 = arith.constant 0 : index
    %c0_31 = arith.constant 0 : index
    %c0_32 = arith.constant 0 : index
    %53 = vector.load %arg6[%c0_30, %c0_31, %c0_32] : memref<1x8x128xf32, #tpu.memory_space<vmem>>, vector<1x8x128xf32>
    %54 = vector.shape_cast %53 : vector<1x8x128xf32> to vector<8x128xf32>
    %55 = vector.shape_cast %52 : vector<8x128xf32> to vector<1x8x128xf32>
    tpu.vector_store %arg6[%c0_30, %c0_31, %c0_32], %55 {strides = array<i32>} : memref<1x8x128xf32, #tpu.memory_space<vmem>>, vector<1x8x128xf32>,
    return
  }
  func.func @transform_0(%arg0: i32, %arg1: i32) -> (i32, i32, i32) {
    %c0_i32 = arith.constant 0 : i32
    %c0_i32_0 = arith.constant 0 : i32
    return %arg0, %arg1, %c0_i32 : i32, i32, i32
  }
  func.func @transform_1(%arg0: i32, %arg1: i32) -> (i32, i32, i32) {
    %c0_i32 = arith.constant 0 : i32
    %c0_i32_0 = arith.constant 0 : i32
    return %arg0, %arg1, %c0_i32 : i32, i32, i32
  }
  func.func @transform_2(%arg0: i32, %arg1: i32) -> (i32, i32, i32) {
    %c0_i32 = arith.constant 0 : i32
    %c0_i32_0 = arith.constant 0 : i32
    %c0_i32_1 = arith.constant 0 : i32
    return %arg0, %c0_i32, %c0_i32_0 : i32, i32, i32
  }
  func.func @transform_3(%arg0: i32, %arg1: i32) -> (i32, i32, i32) {
    %c0_i32 = arith.constant 0 : i32
    %c0_i32_0 = arith.constant 0 : i32
    %c0_i32_1 = arith.constant 0 : i32
    return %arg0, %c0_i32, %c0_i32_0 : i32, i32, i32
  }
  func.func @transform_4(%arg0: i32, %arg1: i32) -> (i32, i32, i32) {
    %c0_i32 = arith.constant 0 : i32
    %c0_i32_0 = arith.constant 0 : i32
    %c0_i32_1 = arith.constant 0 : i32
    return %arg0, %c0_i32, %c0_i32_0 : i32, i32, i32
  }
}

</mosaic_0001>

<bundles_post_ra>
// kernel: tpu_custom_call.1
= control target key start
LH: loop header
LB: loop body
LE: loop exit
PB: predicated region body
PF: predicated region fallthrough
CT: control target
= control target key end

     0   :  { %s1129_s0 = inlined_call_operand.hbm [shape: f32[2,8,128], index: 0, kind: input, shape index: {}]   ;;  %s1130_s1 = inlined_call_operand.hbm [shape: f32[2,8,128], index: 1, kind: input, shape index: {}]   ;;  %s1131_s2 = inlined_call_operand.hbm [shape: f32[2,8,128], index: 2, kind: output, shape index: {0}]   ;;  %s1132_s3 = inlined_call_operand.hbm [shape: f32[2,8,128], index: 3, kind: output, shape index: {1}]   ;;  %s1133_s4 = inlined_call_operand.hbm [shape: f32[2,8,128], index: 4, kind: output, shape index: {2}]  }
   0x1   :  { %1135 = sst [smem:[#allocation15_spill]] %s1129_s0 }
   0x2   :  { %1136 = sst [smem:[#allocation16_spill]] %s1130_s1 }
   0x3   :  { %10 = vsyncpa [#allocation3], 0 }
   0x4   :  { %12 = vsyncpa [#allocation3 + $0x1], 0 }
   0x5   :  { %13 = vsyncpa [#allocation6], 0 }
   0x6   :  { %15 = vsyncpa [#allocation6 + $0x1], 0 }
   0x7   :  { %16 = vsyncpa [#allocation4], 0 }
   0x8   :  { %18 = vsyncpa [#allocation4 + $0x1], 0 }
   0x9   :  { %19 = vsyncpa [#allocation9], 0 }
   0xa   :  { %21 = vsyncpa [#allocation9 + $0x1], 0  ;;  %s882_s15 = smov 0   ;;  %s884_s16 = smov 0  }
   0xb   :  { %s886_s17 = smov 0   ;;  %s888_s18 = smov 0  }
   0xc   :  { %s890_s19 = smov 0   ;;  %s892_s20 = smov 0  }
   0xd LB: > { %s913_s21 = sadd.s32 4294967295, %s850_s20   ;;  %s1134_s22 = sadd.s32 4294967294, %s850_s20   ;;  %s850_s20 = sphi %s892_s20, %s27_s20   ;;  %s846_s19 = sphi %s890_s19, %s1151_s19   ;;  %s842_s18 = sphi %s888_s18, %s1150_s18   ;;  %s838_s17 = sphi %s886_s17, %s1149_s17   ;;  %s834_s16 = sphi %s884_s16, %s1148_s16   ;;  %s830_s15 = sphi %s882_s15, %s1147_s15  }
   0xe   : > { %s39_s23 = sadd.s32 1, %s846_s19  ;;  %s48_s24 = sadd.s32 1, %s838_s17 }
   0xf   : > { %p41_p0 = scmp.ge.s32.totalorder %s39_s23, 2  ;;  %p55_p1 = scmp.ne.s32.totalorder %s838_s17, %s834_s16 }
  0x10   : > { %p56_p2 = scmp.eq.s32.totalorder %s850_s20, 0  ;;  %p61_p3 = scmp.ne.s32.totalorder %s834_s16, %s830_s15 }
  0x11   : > { %s1153_s23 = smov (%p41_p0, %s39_s23), 0  ;;  %p62_p5 = scmp.eq.s32.totalorder %s913_s21, 0 }
  0x12   : > { %p925_p4 = por %p56_p2, %p55_p1  ;;  %s43_s26 = ssub.s32 %s846_s19, %s1153_s23 }
  0x13   : > { %p113_p6 = scmp.eq.s32.totalorder %s913_s21, 1  ;;  %p46_p7 = scmp.eq.s32.totalorder %s43_s26, 0 }
  0x14   : > { %p933_p8 = por %p62_p5, %p61_p3  ;;  %p119_p10 = scmp.eq.s32.totalorder %s1134_s22, 1 }
  0x15   : > { %p937_p9 = por %p113_p6, %p55_p1  ;;  %p597_p13 = scmp.lt.s32.totalorder %s850_s20, 2 }
  0x16   : > { %s944_s29 = scalar_select %p46_p7, %s838_s17, %s48_s24  }
  0x17   : > { %p946_p11 = por %p119_p10, %p61_p3  ;;  %s953_s5 = sand.u32 1, %s838_s17  }
  0x18   : > { %s552_s6 = sshll.u32 %s953_s5, 3  ;;  %s553_s7 = sshll.u32 %s846_s19, 7 }
  0x19   : > { %s1141_s0 = sld [smem:[#allocation15_spill]]  ;;  %s195_s11 = scalar_lea.vmem [#allocation2], %s552_s6 }
  0x1a   : > { %s203_s12 = sshll.u32 %s195_s11, 4  ;;  %p962_p0 = pnand %p597_p13, %p925_p4  ;;  %s204_s12 = int_to_ptr.vmem [resolvable:$true] %s203_s12 }
  0x1b   : > { %p556_p1 = scmp.ge.s32.totalorder %s850_s20, 1  ;;  %p227_p2 = scmp.lt.s32.totalorder %s850_s20, 3 }
  0x1c   : > { %s192_s14 = scalar_lea.sflag [#allocation3], %s953_s5  ;;  %p656_p3 = pneg %p962_p0 }
  0x1d   : > { %s667_s24 = scalar_lea.vmem %s204_s12, 128  ;;  %s852_s26 = smov [#allocation2]  }
  0x1e   : > { %p668_p5 = scmp.ne.s32.totalorder %s204_s12, %s667_s24  ;;  %s672_s8 = sshll.u32 %s852_s26, 4  ;;  %s673_s8 = int_to_ptr.vmem [resolvable:$false] %s672_s8 }
  0x1f   : > { %s201_s10 = scalar_lea.hbm %s1141_s0, %s553_s7  ;;  %s674_s25 = scalar_lea.vmem %s673_s8, 256 }
  0x20   : > { %p670_p6 = pnand %p668_p5, %p656_p3  ;;  %p675_p4 = scmp.lt.s32.totalorder %s204_s12, %s673_s8 }
  0x21   : > { %p676_p10 = scmp.lt.s32.totalorder %s674_s25, %s667_s24 }
  0x22   : > { %p671_p7 = pneg %p670_p6 }
  0x23   : > { %p677_p13 = por %p676_p10, %p675_p4 }
  0x25   : > { %p678_p12 = pnand %p677_p13, %p671_p7 }
  0x27   : > { %681 = shalt.err (!%p678_p12)
}
  0x28   : > { %583 = dma.hbm_to_vmem [thread:$0]  (!%p962_p0), %s201_s10, 128, %s204_s12, %s192_s14  }
  0x29   : > { %p980_p5 = pnand %p556_p1, %p227_p2  ;;  %s1144_s1 = sld [smem:[#allocation16_spill]] }
  0x2a   : > { %s214_s8 = scalar_lea.vmem [#allocation5], %s552_s6  ;;  %s211_s22 = scalar_lea.sflag [#allocation6], %s953_s5 }
  0x2b   : > { %s222_s25 = sshll.u32 %s214_s8, 4  ;;  %s853_s10 = smov [#allocation5]   ;;  %s223_s25 = int_to_ptr.vmem [resolvable:$true] %s222_s25 }
  0x2c   : > { %s695_s0 = scalar_lea.vmem %s223_s25, 128  ;;  %s700_s12 = sshll.u32 %s853_s10, 4  ;;  %s701_s12 = int_to_ptr.vmem [resolvable:$false] %s700_s12 }
  0x2d   : > { %p696_p12 = scmp.ne.s32.totalorder %s223_s25, %s695_s0  ;;  %s702_s14 = scalar_lea.vmem %s701_s12, 256 }
  0x2e   : > { %p703_p1 = scmp.lt.s32.totalorder %s223_s25, %s701_s12  ;;  %p704_p2 = scmp.lt.s32.totalorder %s702_s14, %s695_s0 }
  0x2f   : > { %s220_s24 = scalar_lea.hbm %s1144_s1, %s553_s7  ;;  %p698_p6 = pnand %p696_p12, %p656_p3 }
  0x30   : > { %p705_p4 = por %p704_p2, %p703_p1 }
  0x31   : > { %p699_p7 = pneg %p698_p6 }
  0x33   : > { %p706_p10 = pnand %p705_p4, %p699_p7 }
  0x35   : > { %709 = shalt.err (!%p706_p10)
}
  0x36   : > { %586 = dma.hbm_to_vmem [thread:$0]  (!%p962_p0), %s220_s24, 128, %s223_s25, %s211_s22  }
  0x37   : > { %231 = sbr.rel (%p980_p5) target bundleno = 162 (0xa2), region = 28  ;;  %s996_s5 = sand.u32 (!%p980_p5), 1, %s834_s16  }
  0x38   : > { %s999_s6 = sshll.u32 (!%p980_p5), %s996_s5, 3  ;;  %s234_s7 = scalar_lea.sflag (!%p980_p5), [#allocation3], %s996_s5 }
  0x39   : > { %s237_s0 = scalar_lea.vmem (!%p980_p5), [#allocation2], %s999_s6 }
  0x3c   : > { %813 = dma.done.wait (%p933_p8), %s234_s7, 128  }
  0x3d   : > { %815 = vsyncadd (%p933_p8), %s234_s7, 4294967168  ;;  %s243_s22 = scalar_lea.sflag [#allocation6], %s996_s5  ;;  %s246_s13 = scalar_lea.vmem [#allocation5], %s999_s6 }
  0x3e   : > { %817 = dma.done.wait (%p933_p8), %s243_s22, 128  }
  0x3f   : > { %819 = vsyncadd (%p933_p8), %s243_s22, 4294967168  ;;  %v293_v0 = vld [vmem:[%s237_s0] sm:$0xff]  ;;  %v294_v7 = vld [vmem:[%s246_s13] sm:$0xff]  ;;  %s339_s27 = sand.u32 1, %s913_s21   ;;  %s565_s9 = sshll.u32 %s842_s18, 7 }
  0x40   : > { %v295_v1 = vand.u32 2147483647, %v293_v0  ;;  %v299_v9 = vmax.f32 %v293_v0, 0.0  ;;  %v300_v10 = vmul.f32 %v294_v7, %v293_v0  ;;  %vm314_vm0 = vcmp.ge.f32.partialorder %v293_v0, 0.0  ;;  %s278_s11 = scalar_lea.vmem [#allocation8], %s999_s6  ;;  %s285_s24 = scalar_lea.vmem [#allocation10], %s999_s6 }
  0x41   : > { %s371_s26 = sshll.u32 %s278_s11, 4  ;;  %s384_s8 = sshll.u32 %s285_s24, 4  ;;  %s1023_s26 = int_to_ptr.vmem [resolvable:$true] %s371_s26  ;;  %s1032_s8 = int_to_ptr.vmem [resolvable:$true] %s384_s8 }
  0x42   : > { %v296_v2 = vsub.f32 0.0, %v295_v1  ;;  %v301_v16 = vsub.f32 %v299_v9, %v300_v10  ;;  %s271_s25 = scalar_lea.vmem [#allocation7], %s999_s6  ;;  %s1021_s7 = scalar_lea.hbm %s1132_s3, %s565_s9 }
  0x43   : > { %s358_s10 = sshll.u32 %s271_s25, 4  ;;  %s1028_s0 = scalar_lea.hbm %s1131_s2, %s565_s9  ;;  %s1030_s10 = int_to_ptr.vmem [resolvable:$true] %s358_s10 }
  0x44   : > { %v297_v3 = vmul.f32 1.442695, %v296_v2  ;;  %s1037_s13 = scalar_lea.hbm %s1133_s4, %s565_s9  ;;  %s1039_s12 = scalar_lea.sflag [#allocation9], %s339_s27 }
  0x45   : > { %s710_s14 = scalar_lea.vmem %s1023_s26, 128  ;;  %s854_s18 = smov [#allocation8]  }
  0x46   : > { %648 = vpow2.f32 %v297_v3  ;;  %p711_p8 = scmp.ne.s32.totalorder %s1023_s26, %s710_s14  ;;  %s714_s21 = sshll.u32 %s854_s18, 4  ;;  %s715_s21 = int_to_ptr.vmem [resolvable:$false] %s714_s21 }
  0x47   : > { %s716_s1 = scalar_lea.vmem %s715_s21, 256  ;;  %p717_p13 = scmp.lt.s32.totalorder %s1023_s26, %s715_s21 }
  0x48   : > { %p712_p0 = pnand %p711_p8, %p937_p9  ;;  %p718_p5 = scmp.lt.s32.totalorder %s716_s1, %s710_s14 }
  0x4a   : > { %p713_p3 = pneg %p712_p0  ;;  %p719_p12 = por %p718_p5, %p717_p13 }
  0x4c   : > { %p720_p6 = pnand %p719_p12, %p713_p3 }
  0x53   : > { %v649_v4 = vpop.eup %648 }
  0x54   : > { %v302_v5 = vadd.f32 1.0, %v649_v4  ;;  %v305_v6 = vmul.f32 -0.5, %v649_v4  ;;  %v308_v11 = vand.u32 2147483647, %v649_v4 }
  0x56   : > { %650 = vrcp.f32 %v302_v5  ;;  %v306_v8 = vadd.f32 1.0, %v305_v6  ;;  %vm309_vm1 = vcmp.lt.f32.partialorder %v308_v11, 0.0004427343 }
  0x57   : > { %652 = vlog2.f32 %v302_v5 }
  0x58   : > { %v307_v13 = vmul.f32 %v649_v4, %v306_v8 }
  0x63   : > { %v651_v12 = vpop.eup %650 }
  0x64   : > { %v653_v14 = vpop.eup %652  ;;  %v315_v15 = vmul.f32 %v651_v12, %v649_v4 }
  0x65   : > { %v304_v17 = vmul.f32 0.6931472, %v653_v14 }
  0x66   : > { %v316_v18 = vsel %vm314_vm0, %v651_v12, %v315_v15 }
  0x67   : > { %v317_v19 = vmul.f32 %v316_v18, %v294_v7  ;;  %v310_v20 = vsel %vm309_vm1, %v307_v13, %v304_v17  ;;  %v318_v21 = vadd.f32 %v316_v18, %v294_v7 }
  0x68   : > { %v311_v22 = vadd.f32 %v310_v20, %v301_v16 }
  0x69   : > { %330 = vst [vmem:[%s278_s11] sm:$0xff] %v317_v19  ;;  %333 = vst [vmem:[%s285_s24] sm:$0xff] %v318_v21 }
  0x6a   : > { %327 = vst [vmem:[%s271_s25] sm:$0xff] %v311_v22 }
  0x6b   : > { %723 = shalt.err (!%p720_p6)
}
  0x6c   : > { %s724_s27 = scalar_lea.hbm %s1021_s7, 128  ;;  %s728_s24 = scalar_lea.hbm %s1132_s3, 256 }
  0x6d   : > { %p725_p7 = scmp.ne.s32.totalorder %s1021_s7, %s724_s27  ;;  %p729_p4 = scmp.lt.s32.totalorder %s1021_s7, %s1132_s3 }
  0x6e   : > { %p730_p10 = scmp.lt.s32.totalorder %s728_s24, %s724_s27 }
  0x6f   : > { %p726_p1 = pnand %p725_p7, %p937_p9 }
  0x70   : > { %p731_p8 = por %p730_p10, %p729_p4 }
  0x71   : > { %p727_p2 = pneg %p726_p1 }
  0x73   : > { %p732_p0 = pnand %p731_p8, %p727_p2 }
  0x75   : > { %735 = shalt.err (!%p732_p0)
}
  0x76   : > { %575 = dma.vmem_to_hbm [thread:$0]  (%p937_p9), %s1023_s26, 128, %s1021_s7, %s1039_s12  }
  0x77   : > { %s335_s1 = scalar_lea.sflag [#allocation4], %s996_s5  ;;  %s736_s22 = scalar_lea.vmem %s1030_s10, 128 }
  0x78   : > { %p737_p3 = scmp.ne.s32.totalorder %s1030_s10, %s736_s22  ;;  %s855_s14 = smov [#allocation7]  }
  0x79   : > { %s740_s18 = sshll.u32 %s855_s14, 4  ;;  %s741_s18 = int_to_ptr.vmem [resolvable:$false] %s740_s18 }
  0x7a   : > { %p738_p13 = pnand %p737_p3, %p937_p9  ;;  %s742_s21 = scalar_lea.vmem %s741_s18, 256 }
  0x7b   : > { %p743_p12 = scmp.lt.s32.totalorder %s1030_s10, %s741_s18  ;;  %p744_p6 = scmp.lt.s32.totalorder %s742_s21, %s736_s22 }
  0x7c   : > { %p739_p5 = pneg %p738_p13 }
  0x7d   : > { %p745_p7 = por %p744_p6, %p743_p12 }
  0x7f   : > { %p746_p1 = pnand %p745_p7, %p739_p5 }
  0x81   : > { %749 = shalt.err (!%p746_p1)
}
  0x82   : > { %s750_s26 = scalar_lea.hbm %s1028_s0, 128  ;;  %s754_s27 = scalar_lea.hbm %s1131_s2, 256 }
  0x83   : > { %p751_p2 = scmp.ne.s32.totalorder %s1028_s0, %s750_s26  ;;  %p755_p8 = scmp.lt.s32.totalorder %s1028_s0, %s1131_s2 }
  0x84   : > { %p756_p0 = scmp.lt.s32.totalorder %s754_s27, %s750_s26 }
  0x85   : > { %p752_p4 = pnand %p751_p2, %p937_p9 }
  0x86   : > { %p757_p3 = por %p756_p0, %p755_p8 }
  0x87   : > { %p753_p10 = pneg %p752_p4 }
  0x89   : > { %p758_p13 = pnand %p757_p3, %p753_p10 }
  0x8b   : > { %761 = shalt.err (!%p758_p13)
}
  0x8c   : > { %574 = dma.vmem_to_hbm [thread:$0]  (%p937_p9), %s1030_s10, 128, %s1028_s0, %s335_s1  }
  0x8d   : > { %s762_s24 = scalar_lea.vmem %s1032_s8, 128  ;;  %s856_s25 = smov [#allocation10]  }
  0x8e   : > { %p763_p5 = scmp.ne.s32.totalorder %s1032_s8, %s762_s24  ;;  %s766_s6 = sshll.u32 %s856_s25, 4  ;;  %s767_s6 = int_to_ptr.vmem [resolvable:$false] %s766_s6 }
  0x8f   : > { %s768_s22 = scalar_lea.vmem %s767_s6, 256  ;;  %p769_p7 = scmp.lt.s32.totalorder %s1032_s8, %s767_s6 }
  0x90   : > { %p764_p12 = pnand %p763_p5, %p937_p9  ;;  %p770_p1 = scmp.lt.s32.totalorder %s768_s22, %s762_s24 }
  0x92   : > { %p765_p6 = pneg %p764_p12  ;;  %p771_p2 = por %p770_p1, %p769_p7 }
  0x94   : > { %p772_p4 = pnand %p771_p2, %p765_p6 }
  0x96   : > { %775 = shalt.err (!%p772_p4)
}
  0x97   : > { %s776_s14 = scalar_lea.hbm %s1037_s13, 128  ;;  %s780_s1 = scalar_lea.hbm %s1133_s4, 256 }
  0x98   : > { %p777_p10 = scmp.ne.s32.totalorder %s1037_s13, %s776_s14  ;;  %p781_p3 = scmp.lt.s32.totalorder %s1037_s13, %s1133_s4 }
  0x99   : > { %p782_p13 = scmp.lt.s32.totalorder %s780_s1, %s776_s14 }
  0x9a   : > { %p778_p8 = pnand %p777_p10, %p937_p9 }
  0x9b   : > { %p783_p5 = por %p782_p13, %p781_p3 }
  0x9c   : > { %p779_p0 = pneg %p778_p8 }
  0x9e   : > { %p784_p12 = pnand %p783_p5, %p779_p0 }
  0xa0   : > { %787 = shalt.err (!%p784_p12)
}
  0xa1   : > { %576 = dma.vmem_to_hbm [thread:$0]  (%p937_p9), %s1032_s8, 128, %s1037_s13, %s1039_s12  }
  0xa2 PF: > { %s396_s26 = sand.u32 1, %s830_s15   ;;  %p1145_p6 = scmp.ge.s32.totalorder %s850_s20, 2 }
  0xa3   : > { %s397_s5 = scalar_lea.sflag [#allocation4], %s396_s26 }
  0xa4   : > { %p588_p7 = pnand %p1145_p6, %p946_p11 }
  0xa6   : > { %p589_p1 = pneg %p588_p7 }
  0xa8   : > { %821 = dma.done.wait (%p589_p1), %s397_s5, 128  }
  0xa9   : > { %823 = vsyncadd (%p589_p1), %s397_s5, 4294967168  ;;  %s1146_s7 = sadd.s32 4294967294, %s850_s20  }
  0xaa   : > { %s405_s27 = sand.u32 1, %s1146_s7  }
  0xab   : > { %s406_s28 = scalar_lea.sflag [#allocation9], %s405_s27 }
  0xac   : > { %825 = dma.done.wait (%p589_p1), %s406_s28, 256  }
  0xad   : > { %827 = vsyncadd (%p589_p1), %s406_s28, 4294967040  ;;  %s27_s20 = sadd.s32 1, %s850_s20   ;;  %s1147_s15 = smov %s834_s16 }
  0xae   : > { %p24_p9 = scmp.ge.s32.totalorder %s27_s20, 4   ;;  %s1148_s16 = smov %s838_s17 }
  0xaf   : > { %s1149_s17 = smov %s944_s29  ;;  %s1150_s18 = smov %s846_s19 }
  0xb0   : > { %s1151_s19 = smov %s1153_s23  ;;  %26 = sbr.rel (!%p24_p9) target bundleno = 13 (0xd), region = 122 }
  0xb5   :  { %420 = vsyncpa [#allocation3], 1 }
  0xb6   :  { %422 = vsyncpa [#allocation3 + $0x1], 1 }
  0xb7   :  { %423 = vsyncpa [#allocation6], 1 }
  0xb8   :  { %425 = vsyncpa [#allocation6 + $0x1], 1 }
  0xb9   :  { %426 = vsyncpa [#allocation4], 1 }
  0xba   :  { %428 = vsyncpa [#allocation4 + $0x1], 1 }
  0xbb   :  { %429 = vsyncpa [#allocation9], 1 }
  0xbc   :  { %431 = vsyncpa [#allocation9 + $0x1], 1 }

</bundles_post_ra>
